<compile_context>
chip_gen: v6e
topology: v6e:2x2x1
jax: 0.10.0
libtpu: 0.0.40
codegen_flags: <defaults>
</compile_context>

<pallas_src>
import jax
import jax.numpy as jnp
from jax import lax
from jax.experimental import pallas as pl
from jax.experimental.pallas import tpu as pltpu

# ----------------------------- configuration -------------------------------
B = 2          # batch
C_IN = 8       # in_channels
C_OUT = 16     # out_channels
T = 128        # sequence length
K = 3          # depthwise kernel_size
DIL = 2        # dilation
PAD = 2        # padding  ->  T_OUT = T + 2*PAD - DIL*(K-1) = T
T_OUT = T + 2 * PAD - DIL * (K - 1)
BT = B * T
EPS = 1e-8

# The roll-based depthwise path assumes "same" length output.
assert T_OUT == T, "roll-based depthwise conv assumes T_OUT == T"
# Packed-parameter row dim serves both C_OUT-indexed and (2*C_IN)-indexed rows.
assert 2 * C_IN == C_OUT, "param packing assumes 2*C_IN == C_OUT"

# Packed layout (rows = 16): [w1(0:8) | wd(8:11) | b1 g1 be1 bd g2 be2 alpha | wrs(18:34) | brs]
NR = C_OUT
NPC = C_IN + K + 7 + C_OUT + 1   # = 35


# ------------------------------- kernel ------------------------------------
def _dwconv_block_kernel(x_ref, p_ref, out_ref):
    x = x_ref[...]                                  # (C_IN, BT)
    p = p_ref[...]                                  # (NR, NPC)

    # ---- unpack parameters (constant lane slices of one small tile) ----
    c = C_IN
    w1 = p[:, 0:c]                                  # (C_OUT, C_IN)
    wd = p[:, c:c + K]                              # (C_OUT, K)
    b1 = p[:, c + K + 0:c + K + 1]                  # (C_OUT, 1)
    g1 = p[:, c + K + 1:c + K + 2]
    be1 = p[:, c + K + 2:c + K + 3]
    bd = p[:, c + K + 3:c + K + 4]
    g2 = p[:, c + K + 4:c + K + 5]
    be2 = p[:, c + K + 5:c + K + 6]
    alpha = p[:, c + K + 6:c + K + 7]               # shared PReLU slope, replicated
    o0 = c + K + 7
    wrs = p[:, o0:o0 + C_OUT]                       # (2*C_IN, C_OUT) stacked res/skip
    brs = p[:, o0 + C_OUT:o0 + C_OUT + 1]           # (2*C_IN, 1)

    # ---- 1x1 in->out conv on the MXU + shared-slope PReLU ----
    h = jnp.dot(w1, x, preferred_element_type=jnp.float32) + b1     # (C_OUT, BT)
    h = jnp.where(h >= 0, h, alpha * h)

    # ---- lane bookkeeping (built once, reused everywhere) ----
    iota = lax.broadcasted_iota(jnp.int32, (C_OUT, BT), 1)
    local_t = (iota & (T - 1)) if (T & (T - 1)) == 0 else (iota % T)

    # ---- depthwise dilated conv on the RAW activations (XLU rolls + masks).
    #      GroupNorm1 (hn = s1*h + sh1) is folded in afterwards:
    #        y = bd + s1_map*acc + sh1_map*wmsum
    #        acc   = sum_k wd_k * mask_k(t) * h[t + off_k]
    #        wmsum = sum_k wd_k * mask_k(t)
    #      so the rolls overlap the mean/var/rsqrt chain and padded columns
    #      still see "zero in normalized space".
    acc = None
    wmsum = None
    for k in range(K):
        off = k * DIL - PAD                          # -2, 0, +2
        tap = wd[:, k:k + 1]                         # (C_OUT, 1)
        if off == 0:
            a_k, w_k = tap * h, tap
        else:
            rolled = pltpu.roll(h, shift=(-off) % BT, axis=1)   # non-negative shift
            mask = (local_t >= -off) if off < 0 else (local_t < T - off)
            a_k = tap * jnp.where(mask, rolled, 0.0)
            w_k = tap * mask.astype(jnp.float32)
        acc = a_k if acc is None else acc + a_k
        wmsum = w_k if wmsum is None else wmsum + w_k

    # ---- per-batch GroupNorm stats on the tile-aligned 128-lane halves ----
    def gn_maps(v, g, be):
        s_map = sh_map = None
        for b in range(B):
            vb = v[:, b * T:(b + 1) * T]
            m = jnp.mean(vb)
            var = jnp.maximum(jnp.mean(vb * vb) - m * m, 0.0)
            s = g * lax.rsqrt(var + EPS)             # (C_OUT, 1)
            sh = be - m * s
            if b == 0:
                s_map = jnp.broadcast_to(s, (C_OUT, BT))
                sh_map = jnp.broadcast_to(sh, (C_OUT, BT))
            else:
                in_b = iota >= b * T
                s_map = jnp.where(in_b, s, s_map)
                sh_map = jnp.where(in_b, sh, sh_map)
        return s_map, sh_map

    s1_map, sh1_map = gn_maps(h, g1, be1)
    y = bd + s1_map * acc + sh1_map * wmsum          # depthwise output, GN1 folded

    # ---- PReLU + per-batch GroupNorm2, then fused residual+skip 1x1 matmul ----
    y = jnp.where(y >= 0, y, alpha * y)
    s2_map, sh2_map = gn_maps(y, g2, be2)
    y = y * s2_map + sh2_map

    out_ref[...] = jnp.dot(wrs, y, preferred_element_type=jnp.float32) + brs


# ------------------------------- wrapper ------------------------------------
@jax.jit
def depthwise_conv1d_block(x, w1, b1, alpha, g1, be1, wd, bd, g2, be2,
                           wr, br, ws, bs):
    """x: (B, C_IN, T) float32 -> (residual, skip), each (B, C_IN, T_OUT)."""
    # Stack the batch along lanes (layout plumbing done by XLA outside the kernel).
    x2 = jnp.transpose(x, (1, 0, 2)).reshape(C_IN, BT).astype(jnp.float32)

    # Pack every parameter into one (16, 35) tensor -> 2 input DMA descriptors.
    col = lambda v: jnp.reshape(v, (-1, 1)).astype(jnp.float32)
    alpha_col = jnp.broadcast_to(jnp.reshape(alpha, (1, 1)).astype(jnp.float32),
                                 (C_OUT, 1))
    p = jnp.concatenate(
        [w1, wd, col(b1), col(g1), col(be1), col(bd), col(g2), col(be2),
         alpha_col,
         jnp.concatenate([wr, ws], axis=0),          # (2*C_IN, C_OUT)
         col(jnp.concatenate([br, bs], axis=0))],    # (2*C_IN, 1)
        axis=1)

    z = pl.pallas_call(
        _dwconv_block_kernel,
        grid=(1,),
        in_specs=[pl.BlockSpec((C_IN, BT), lambda i: (0, 0)),
                  pl.BlockSpec((NR, NPC), lambda i: (0, 0))],
        out_specs=pl.BlockSpec((2 * C_IN, BT), lambda i: (0, 0)),
        out_shape=jax.ShapeDtypeStruct((2 * C_IN, BT), jnp.float32),
        compiler_params=pltpu.CompilerParams(
            dimension_semantics=("arbitrary",)),
    )(x2, p)

    # Un-stack: (2*C_IN, B*T) -> (B, 2*C_IN, T); split residual / skip halves.
    z = jnp.transpose(z.reshape(2 * C_IN, B, T_OUT), (1, 0, 2))
    return z[:, :C_IN, :], z[:, C_IN:, :]


# ---------------------------- pure-JAX reference ----------------------------
def _reference(x, w1, b1, alpha, g1, be1, wd, bd, g2, be2, wr, br, ws, bs):
    def prelu(v):
        return jnp.where(v >= 0, v, alpha * v)

    def gnorm(v, g, be):
        m = v.mean(axis=(1, 2), keepdims=True)
        var = ((v - m) ** 2).mean(axis=(1, 2), keepdims=True)
        return (v - m) / jnp.sqrt(var + EPS) * g[None, :, None] + be[None, :, None]

    h = jnp.einsum("oc,bct->bot", w1, x) + b1[None, :, None]
    h = gnorm(prelu(h), g1, be1)
    hp = jnp.pad(h, ((0, 0), (0, 0), (PAD, PAD)))
    y = sum(wd[None, :, k:k + 1] * hp[:, :, k * DIL:k * DIL + T_OUT]
            for k in range(K)) + bd[None, :, None]
    y = gnorm(prelu(y), g2, be2)
    res = jnp.einsum("io,bot->bit", wr, y) + br[None, :, None]
    skip = jnp.einsum("io,bot->bit", ws, y) + bs[None, :, None]
    return res, skip


# --------------------------------- main -------------------------------------
if __name__ == "__main__":
    key = jax.random.PRNGKey(0)
    ks = jax.random.split(key, 12)

    x = jax.random.normal(ks[0], (B, C_IN, T), jnp.float32)

    # Deterministic parameter init (synthetic; matches PyTorch module shapes).
    w1 = jax.random.normal(ks[1], (C_OUT, C_IN), jnp.float32) * 0.1
    b1 = jax.random.normal(ks[2], (C_OUT,), jnp.float32) * 0.1
    alpha = jnp.float32(0.25)                               # PReLU default init
    g1 = jnp.ones((C_OUT,), jnp.float32)
    be1 = jnp.zeros((C_OUT,), jnp.float32)
    wd = jax.random.normal(ks[3], (C_OUT, K), jnp.float32) * 0.1   # depthwise
    bd = jax.random.normal(ks[4], (C_OUT,), jnp.float32) * 0.1
    g2 = jnp.ones((C_OUT,), jnp.float32)
    be2 = jnp.zeros((C_OUT,), jnp.float32)
    wr = jax.random.normal(ks[5], (C_IN, C_OUT), jnp.float32) * 0.1
    br = jax.random.normal(ks[6], (C_IN,), jnp.float32) * 0.1
    ws = jax.random.normal(ks[7], (C_IN, C_OUT), jnp.float32) * 0.1
    bs = jax.random.normal(ks[8], (C_IN,), jnp.float32) * 0.1

    params = (w1, b1, alpha, g1, be1, wd, bd, g2, be2, wr, br, ws, bs)

    res, skip = depthwise_conv1d_block(x, *params)
    jax.block_until_ready((res, skip))

    res_ref, skip_ref = _reference(x, *params)
    assert jnp.allclose(res, res_ref, atol=1e-4, rtol=1e-4), "residual mismatch"
    assert jnp.allclose(skip, skip_ref, atol=1e-4, rtol=1e-4), "skip mismatch"

    print("KERNEL_OK")
</pallas_src>

<mosaic_0001>
module attributes {stable_mosaic.version = 11 : i64} {
  func.func @_dwconv_block_kernel(%arg0: i32, %arg1: memref<8x256xf32, #tpu.memory_space<vmem>>, %arg2: memref<16x35xf32, #tpu.memory_space<vmem>>, %arg3: memref<16x256xf32, #tpu.memory_space<vmem>>) attributes {dimension_semantics = [#tpu.dimension_semantics<arbitrary>], iteration_bounds = array<i64: 1>, scalar_prefetch = 0 : i64, scratch_operands = 0 : i64, tpu.core_type = #tpu.core_type<tc>, window_params = [{pipeline_mode = #tpu.pipeline_mode<synchronous>, transform_indices = @transform_0, window_bounds = array<i64: 8, 256>}, {pipeline_mode = #tpu.pipeline_mode<synchronous>, transform_indices = @transform_1, window_bounds = array<i64: 16, 35>}, {pipeline_mode = #tpu.pipeline_mode<synchronous>, transform_indices = @transform_2, window_bounds = array<i64: 16, 256>}]} {
    %c0 = arith.constant 0 : index
    %c0_0 = arith.constant 0 : index
    %0 = vector.load %arg1[%c0, %c0_0] : memref<8x256xf32, #tpu.memory_space<vmem>>, vector<8x256xf32>
    %c0_1 = arith.constant 0 : index
    %c0_2 = arith.constant 0 : index
    %1 = vector.load %arg2[%c0_1, %c0_2] : memref<16x35xf32, #tpu.memory_space<vmem>>, vector<16x35xf32>
    %2 = vector.extract_strided_slice %1 {offsets = [0, 0], sizes = [16, 8], strides = [1, 1]} : vector<16x35xf32> to vector<16x8xf32>
    %3 = vector.extract_strided_slice %1 {offsets = [0, 8], sizes = [16, 3], strides = [1, 1]} : vector<16x35xf32> to vector<16x3xf32>
    %4 = vector.extract_strided_slice %1 {offsets = [0, 11], sizes = [16, 1], strides = [1, 1]} : vector<16x35xf32> to vector<16x1xf32>
    %5 = vector.extract_strided_slice %1 {offsets = [0, 12], sizes = [16, 1], strides = [1, 1]} : vector<16x35xf32> to vector<16x1xf32>
    %6 = vector.extract_strided_slice %1 {offsets = [0, 13], sizes = [16, 1], strides = [1, 1]} : vector<16x35xf32> to vector<16x1xf32>
    %7 = vector.extract_strided_slice %1 {offsets = [0, 14], sizes = [16, 1], strides = [1, 1]} : vector<16x35xf32> to vector<16x1xf32>
    %8 = vector.extract_strided_slice %1 {offsets = [0, 15], sizes = [16, 1], strides = [1, 1]} : vector<16x35xf32> to vector<16x1xf32>
    %9 = vector.extract_strided_slice %1 {offsets = [0, 16], sizes = [16, 1], strides = [1, 1]} : vector<16x35xf32> to vector<16x1xf32>
    %10 = vector.extract_strided_slice %1 {offsets = [0, 17], sizes = [16, 1], strides = [1, 1]} : vector<16x35xf32> to vector<16x1xf32>
    %11 = vector.extract_strided_slice %1 {offsets = [0, 18], sizes = [16, 16], strides = [1, 1]} : vector<16x35xf32> to vector<16x16xf32>
    %12 = vector.extract_strided_slice %1 {offsets = [0, 34], sizes = [16, 1], strides = [1, 1]} : vector<16x35xf32> to vector<16x1xf32>
    %cst = arith.constant dense<0.000000e+00> : vector<16x256xf32>
    %13 = tpu.matmul %2, %0, %cst {dimension_numbers = #tpu.dot_dimension_numbers<[1], [0], [0], [1], [0, 0, 1, 1], [], []>} : vector<16x8xf32>, vector<8x256xf32>, vector<16x256xf32> -> vector<16x256xf32>
    %14 = vector.broadcast %4 : vector<16x1xf32> to vector<16x256xf32>
    %15 = arith.addf %13, %14 : vector<16x256xf32>
    %cst_3 = arith.constant 0.000000e+00 : f32
    %16 = vector.broadcast %cst_3 : f32 to vector<16x256xf32>
    %17 = arith.cmpf oge, %15, %16 : vector<16x256xf32>
    %18 = vector.broadcast %10 : vector<16x1xf32> to vector<16x256xf32>
    %19 = arith.mulf %18, %15 : vector<16x256xf32>
    %20 = arith.select %17, %15, %19 : vector<16x256xi1>, vector<16x256xf32>
    %21 = tpu.iota {dimensions = array<i32: 1>} : vector<16x256xi32>
    %c127_i32 = arith.constant 127 : i32
    %22 = vector.broadcast %c127_i32 : i32 to vector<16x256xi32>
    %23 = arith.andi %21, %22 : vector<16x256xi32>
    %24 = vector.extract_strided_slice %3 {offsets = [0, 0], sizes = [16, 1], strides = [1, 1]} : vector<16x3xf32> to vector<16x1xf32>
    %c2_i32 = arith.constant 2 : i32
    %25 = tpu.dynamic_rotate %20 by %c2_i32 dim 1 : vector<16x256xf32>, i32 -> vector<16x256xf32>
    %c2_i32_4 = arith.constant 2 : i32
    %26 = vector.broadcast %c2_i32_4 : i32 to vector<16x256xi32>
    %27 = arith.cmpi sge, %23, %26 : vector<16x256xi32>
    %cst_5 = arith.constant 0.000000e+00 : f32
    %28 = vector.broadcast %cst_5 : f32 to vector<16x256xf32>
    %29 = arith.select %27, %25, %28 : vector<16x256xi1>, vector<16x256xf32>
    %30 = vector.broadcast %24 : vector<16x1xf32> to vector<16x256xf32>
    %31 = arith.mulf %30, %29 : vector<16x256xf32>
    %32 = arith.extui %27 : vector<16x256xi1> to vector<16x256xi32>
    %33 = arith.sitofp %32 : vector<16x256xi32> to vector<16x256xf32>
    %34 = vector.broadcast %24 : vector<16x1xf32> to vector<16x256xf32>
    %35 = arith.mulf %34, %33 : vector<16x256xf32>
    %36 = vector.extract_strided_slice %3 {offsets = [0, 1], sizes = [16, 1], strides = [1, 1]} : vector<16x3xf32> to vector<16x1xf32>
    %37 = vector.broadcast %36 : vector<16x1xf32> to vector<16x256xf32>
    %38 = arith.mulf %37, %20 : vector<16x256xf32>
    %39 = arith.addf %31, %38 : vector<16x256xf32>
    %40 = vector.broadcast %36 : vector<16x1xf32> to vector<16x256xf32>
    %41 = arith.addf %35, %40 : vector<16x256xf32>
    %42 = vector.extract_strided_slice %3 {offsets = [0, 2], sizes = [16, 1], strides = [1, 1]} : vector<16x3xf32> to vector<16x1xf32>
    %c254_i32 = arith.constant 254 : i32
    %43 = tpu.dynamic_rotate %20 by %c254_i32 dim 1 : vector<16x256xf32>, i32 -> vector<16x256xf32>
    %c126_i32 = arith.constant 126 : i32
    %44 = vector.broadcast %c126_i32 : i32 to vector<16x256xi32>
    %45 = arith.cmpi slt, %23, %44 : vector<16x256xi32>
    %cst_6 = arith.constant 0.000000e+00 : f32
    %46 = vector.broadcast %cst_6 : f32 to vector<16x256xf32>
    %47 = arith.select %45, %43, %46 : vector<16x256xi1>, vector<16x256xf32>
    %48 = vector.broadcast %42 : vector<16x1xf32> to vector<16x256xf32>
    %49 = arith.mulf %48, %47 : vector<16x256xf32>
    %50 = arith.extui %45 : vector<16x256xi1> to vector<16x256xi32>
    %51 = arith.sitofp %50 : vector<16x256xi32> to vector<16x256xf32>
    %52 = vector.broadcast %42 : vector<16x1xf32> to vector<16x256xf32>
    %53 = arith.mulf %52, %51 : vector<16x256xf32>
    %54 = arith.addf %39, %49 : vector<16x256xf32>
    %55 = arith.addf %41, %53 : vector<16x256xf32>
    %56 = vector.extract_strided_slice %20 {offsets = [0, 0], sizes = [16, 128], strides = [1, 1]} : vector<16x256xf32> to vector<16x128xf32>
    %57 = vector.shape_cast %56 : vector<16x128xf32> to vector<1x16x128xf32>
    %cst_7 = arith.constant dense<0.000000e+00> : vector<1xf32>
    %58 = vector.multi_reduction <add>, %57, %cst_7 [1, 2] : vector<1x16x128xf32> to vector<1xf32>
    %59 = vector.shape_cast %58 : vector<1xf32> to vector<1x1x1xf32>
    %60 = vector.extract %59[0, 0, 0] : f32 from vector<1x1x1xf32>
    %cst_8 = arith.constant 2.048000e+03 : f32
    %61 = arith.divf %60, %cst_8 : f32
    %62 = arith.mulf %56, %56 : vector<16x128xf32>
    %63 = vector.shape_cast %62 : vector<16x128xf32> to vector<1x16x128xf32>
    %cst_9 = arith.constant dense<0.000000e+00> : vector<1xf32>
    %64 = vector.multi_reduction <add>, %63, %cst_9 [1, 2] : vector<1x16x128xf32> to vector<1xf32>
    %65 = vector.shape_cast %64 : vector<1xf32> to vector<1x1x1xf32>
    %66 = vector.extract %65[0, 0, 0] : f32 from vector<1x1x1xf32>
    %cst_10 = arith.constant 2.048000e+03 : f32
    %67 = arith.divf %66, %cst_10 : f32
    %68 = arith.mulf %61, %61 : f32
    %69 = arith.subf %67, %68 : f32
    %cst_11 = arith.constant 0.000000e+00 : f32
    %70 = arith.maximumf %69, %cst_11 : f32
    %cst_12 = arith.constant 9.99999993E-9 : f32
    %71 = arith.addf %70, %cst_12 : f32
    %72 = math.rsqrt %71 : f32
    %73 = vector.broadcast %72 : f32 to vector<16x1xf32>
    %74 = arith.mulf %5, %73 : vector<16x1xf32>
    %75 = vector.broadcast %61 : f32 to vector<16x1xf32>
    %76 = arith.mulf %75, %74 : vector<16x1xf32>
    %77 = arith.subf %6, %76 : vector<16x1xf32>
    %78 = vector.shape_cast %74 : vector<16x1xf32> to vector<16x1xf32>
    %79 = vector.broadcast %78 : vector<16x1xf32> to vector<16x256xf32>
    %80 = vector.shape_cast %77 : vector<16x1xf32> to vector<16x1xf32>
    %81 = vector.broadcast %80 : vector<16x1xf32> to vector<16x256xf32>
    %82 = vector.extract_strided_slice %20 {offsets = [0, 128], sizes = [16, 128], strides = [1, 1]} : vector<16x256xf32> to vector<16x128xf32>
    %83 = vector.shape_cast %82 : vector<16x128xf32> to vector<1x16x128xf32>
    %cst_13 = arith.constant dense<0.000000e+00> : vector<1xf32>
    %84 = vector.multi_reduction <add>, %83, %cst_13 [1, 2] : vector<1x16x128xf32> to vector<1xf32>
    %85 = vector.shape_cast %84 : vector<1xf32> to vector<1x1x1xf32>
    %86 = vector.extract %85[0, 0, 0] : f32 from vector<1x1x1xf32>
    %cst_14 = arith.constant 2.048000e+03 : f32
    %87 = arith.divf %86, %cst_14 : f32
    %88 = arith.mulf %82, %82 : vector<16x128xf32>
    %89 = vector.shape_cast %88 : vector<16x128xf32> to vector<1x16x128xf32>
    %cst_15 = arith.constant dense<0.000000e+00> : vector<1xf32>
    %90 = vector.multi_reduction <add>, %89, %cst_15 [1, 2] : vector<1x16x128xf32> to vector<1xf32>
    %91 = vector.shape_cast %90 : vector<1xf32> to vector<1x1x1xf32>
    %92 = vector.extract %91[0, 0, 0] : f32 from vector<1x1x1xf32>
    %cst_16 = arith.constant 2.048000e+03 : f32
    %93 = arith.divf %92, %cst_16 : f32
    %94 = arith.mulf %87, %87 : f32
    %95 = arith.subf %93, %94 : f32
    %cst_17 = arith.constant 0.000000e+00 : f32
    %96 = arith.maximumf %95, %cst_17 : f32
    %cst_18 = arith.constant 9.99999993E-9 : f32
    %97 = arith.addf %96, %cst_18 : f32
    %98 = math.rsqrt %97 : f32
    %99 = vector.broadcast %98 : f32 to vector<16x1xf32>
    %100 = arith.mulf %5, %99 : vector<16x1xf32>
    %101 = vector.broadcast %87 : f32 to vector<16x1xf32>
    %102 = arith.mulf %101, %100 : vector<16x1xf32>
    %103 = arith.subf %6, %102 : vector<16x1xf32>
    %c128_i32 = arith.constant 128 : i32
    %104 = vector.broadcast %c128_i32 : i32 to vector<16x256xi32>
    %105 = arith.cmpi sge, %21, %104 : vector<16x256xi32>
    %106 = vector.shape_cast %100 : vector<16x1xf32> to vector<16x1xf32>
    %107 = vector.broadcast %106 : vector<16x1xf32> to vector<16x256xf32>
    %108 = arith.select %105, %107, %79 : vector<16x256xi1>, vector<16x256xf32>
    %109 = vector.shape_cast %103 : vector<16x1xf32> to vector<16x1xf32>
    %110 = vector.broadcast %109 : vector<16x1xf32> to vector<16x256xf32>
    %111 = arith.select %105, %110, %81 : vector<16x256xi1>, vector<16x256xf32>
    %112 = arith.mulf %108, %54 : vector<16x256xf32>
    %113 = vector.broadcast %7 : vector<16x1xf32> to vector<16x256xf32>
    %114 = arith.addf %113, %112 : vector<16x256xf32>
    %115 = arith.mulf %111, %55 : vector<16x256xf32>
    %116 = arith.addf %114, %115 : vector<16x256xf32>
    %cst_19 = arith.constant 0.000000e+00 : f32
    %117 = vector.broadcast %cst_19 : f32 to vector<16x256xf32>
    %118 = arith.cmpf oge, %116, %117 : vector<16x256xf32>
    %119 = vector.broadcast %10 : vector<16x1xf32> to vector<16x256xf32>
    %120 = arith.mulf %119, %116 : vector<16x256xf32>
    %121 = arith.select %118, %116, %120 : vector<16x256xi1>, vector<16x256xf32>
    %122 = vector.extract_strided_slice %121 {offsets = [0, 0], sizes = [16, 128], strides = [1, 1]} : vector<16x256xf32> to vector<16x128xf32>
    %123 = vector.shape_cast %122 : vector<16x128xf32> to vector<1x16x128xf32>
    %cst_20 = arith.constant dense<0.000000e+00> : vector<1xf32>
    %124 = vector.multi_reduction <add>, %123, %cst_20 [1, 2] : vector<1x16x128xf32> to vector<1xf32>
    %125 = vector.shape_cast %124 : vector<1xf32> to vector<1x1x1xf32>
    %126 = vector.extract %125[0, 0, 0] : f32 from vector<1x1x1xf32>
    %cst_21 = arith.constant 2.048000e+03 : f32
    %127 = arith.divf %126, %cst_21 : f32
    %128 = arith.mulf %122, %122 : vector<16x128xf32>
    %129 = vector.shape_cast %128 : vector<16x128xf32> to vector<1x16x128xf32>
    %cst_22 = arith.constant dense<0.000000e+00> : vector<1xf32>
    %130 = vector.multi_reduction <add>, %129, %cst_22 [1, 2] : vector<1x16x128xf32> to vector<1xf32>
    %131 = vector.shape_cast %130 : vector<1xf32> to vector<1x1x1xf32>
    %132 = vector.extract %131[0, 0, 0] : f32 from vector<1x1x1xf32>
    %cst_23 = arith.constant 2.048000e+03 : f32
    %133 = arith.divf %132, %cst_23 : f32
    %134 = arith.mulf %127, %127 : f32
    %135 = arith.subf %133, %134 : f32
    %cst_24 = arith.constant 0.000000e+00 : f32
    %136 = arith.maximumf %135, %cst_24 : f32
    %cst_25 = arith.constant 9.99999993E-9 : f32
    %137 = arith.addf %136, %cst_25 : f32
    %138 = math.rsqrt %137 : f32
    %139 = vector.broadcast %138 : f32 to vector<16x1xf32>
    %140 = arith.mulf %8, %139 : vector<16x1xf32>
    %141 = vector.broadcast %127 : f32 to vector<16x1xf32>
    %142 = arith.mulf %141, %140 : vector<16x1xf32>
    %143 = arith.subf %9, %142 : vector<16x1xf32>
    %144 = vector.shape_cast %140 : vector<16x1xf32> to vector<16x1xf32>
    %145 = vector.broadcast %144 : vector<16x1xf32> to vector<16x256xf32>
    %146 = vector.shape_cast %143 : vector<16x1xf32> to vector<16x1xf32>
    %147 = vector.broadcast %146 : vector<16x1xf32> to vector<16x256xf32>
    %148 = vector.extract_strided_slice %121 {offsets = [0, 128], sizes = [16, 128], strides = [1, 1]} : vector<16x256xf32> to vector<16x128xf32>
    %149 = vector.shape_cast %148 : vector<16x128xf32> to vector<1x16x128xf32>
    %cst_26 = arith.constant dense<0.000000e+00> : vector<1xf32>
    %150 = vector.multi_reduction <add>, %149, %cst_26 [1, 2] : vector<1x16x128xf32> to vector<1xf32>
    %151 = vector.shape_cast %150 : vector<1xf32> to vector<1x1x1xf32>
    %152 = vector.extract %151[0, 0, 0] : f32 from vector<1x1x1xf32>
    %cst_27 = arith.constant 2.048000e+03 : f32
    %153 = arith.divf %152, %cst_27 : f32
    %154 = arith.mulf %148, %148 : vector<16x128xf32>
    %155 = vector.shape_cast %154 : vector<16x128xf32> to vector<1x16x128xf32>
    %cst_28 = arith.constant dense<0.000000e+00> : vector<1xf32>
    %156 = vector.multi_reduction <add>, %155, %cst_28 [1, 2] : vector<1x16x128xf32> to vector<1xf32>
    %157 = vector.shape_cast %156 : vector<1xf32> to vector<1x1x1xf32>
    %158 = vector.extract %157[0, 0, 0] : f32 from vector<1x1x1xf32>
    %cst_29 = arith.constant 2.048000e+03 : f32
    %159 = arith.divf %158, %cst_29 : f32
    %160 = arith.mulf %153, %153 : f32
    %161 = arith.subf %159, %160 : f32
    %cst_30 = arith.constant 0.000000e+00 : f32
    %162 = arith.maximumf %161, %cst_30 : f32
    %cst_31 = arith.constant 9.99999993E-9 : f32
    %163 = arith.addf %162, %cst_31 : f32
    %164 = math.rsqrt %163 : f32
    %165 = vector.broadcast %164 : f32 to vector<16x1xf32>
    %166 = arith.mulf %8, %165 : vector<16x1xf32>
    %167 = vector.broadcast %153 : f32 to vector<16x1xf32>
    %168 = arith.mulf %167, %166 : vector<16x1xf32>
    %169 = arith.subf %9, %168 : vector<16x1xf32>
    %c128_i32_32 = arith.constant 128 : i32
    %170 = vector.broadcast %c128_i32_32 : i32 to vector<16x256xi32>
    %171 = arith.cmpi sge, %21, %170 : vector<16x256xi32>
    %172 = vector.shape_cast %166 : vector<16x1xf32> to vector<16x1xf32>
    %173 = vector.broadcast %172 : vector<16x1xf32> to vector<16x256xf32>
    %174 = arith.select %171, %173, %145 : vector<16x256xi1>, vector<16x256xf32>
    %175 = vector.shape_cast %169 : vector<16x1xf32> to vector<16x1xf32>
    %176 = vector.broadcast %175 : vector<16x1xf32> to vector<16x256xf32>
    %177 = arith.select %171, %176, %147 : vector<16x256xi1>, vector<16x256xf32>
    %178 = arith.mulf %121, %174 : vector<16x256xf32>
    %179 = arith.addf %178, %177 : vector<16x256xf32>
    %cst_33 = arith.constant dense<0.000000e+00> : vector<16x256xf32>
    %180 = tpu.matmul %11, %179, %cst_33 {dimension_numbers = #tpu.dot_dimension_numbers<[1], [0], [0], [1], [0, 0, 1, 1], [], []>} : vector<16x16xf32>, vector<16x256xf32>, vector<16x256xf32> -> vector<16x256xf32>
    %181 = vector.broadcast %12 : vector<16x1xf32> to vector<16x256xf32>
    %182 = arith.addf %180, %181 : vector<16x256xf32>
    %c0_34 = arith.constant 0 : index
    %c0_35 = arith.constant 0 : index
    %183 = vector.load %arg3[%c0_34, %c0_35] : memref<16x256xf32, #tpu.memory_space<vmem>>, vector<16x256xf32>
    tpu.vector_store %arg3[%c0_34, %c0_35], %182 {strides = array<i32>} : memref<16x256xf32, #tpu.memory_space<vmem>>, vector<16x256xf32>,
    return
  }
  func.func @transform_0(%arg0: i32) -> (i32, i32) {
    %c0_i32 = arith.constant 0 : i32
    %c0_i32_0 = arith.constant 0 : i32
    %c0_i32_1 = arith.constant 0 : i32
    return %c0_i32, %c0_i32_0 : i32, i32
  }
  func.func @transform_1(%arg0: i32) -> (i32, i32) {
    %c0_i32 = arith.constant 0 : i32
    %c0_i32_0 = arith.constant 0 : i32
    %c0_i32_1 = arith.constant 0 : i32
    return %c0_i32, %c0_i32_0 : i32, i32
  }
  func.func @transform_2(%arg0: i32) -> (i32, i32) {
    %c0_i32 = arith.constant 0 : i32
    %c0_i32_0 = arith.constant 0 : i32
    %c0_i32_1 = arith.constant 0 : i32
    return %c0_i32, %c0_i32_0 : i32, i32
  }
}

</mosaic_0001>

<bundles_post_ra>
// kernel: depthwise_conv1d_block.1
= control target key start
LH: loop header
LB: loop body
LE: loop exit
PB: predicated region body
PF: predicated region fallthrough
CT: control target
= control target key end

     0   :  { %v764_v2 = vmov 0.0   ;;  %vm25_vm0 = vcmask 64512   ;;  %v765_v4 = vmov 11   ;;  %v766_v5 = vmov 17   ;;  %s769_s21 = smov 0.0   ;;  %s770_s3 = smov 1   ;;  %s1033_s0 = inlined_call_operand.vmem [shape: f32[8,256], index: 0, kind: input, shape index: {}]   ;;  %s1034_s1 = inlined_call_operand.vmem [shape: f32[16,35], index: 1, kind: input, shape index: {}]   ;;  %s1035_s2 = inlined_call_operand.vmem [shape: f32[16,256], index: 2, kind: output, shape index: {}]  }
   0x1   :  { %v12_v0 = vld [vmem:[%s1033_s0 + $0x8] sm:$0xff]  ;;  %v11_v1 = vld [vmem:[%s1033_s0] sm:$0xff]  ;;  %94 = vmatprep.mubr.f32.mxu0 %v764_v2  ;;  %735 = vset.pattern.permute.xlu0 %v765_v4  ;;  %v767_v49 = vmov 8   ;;  %v768_v50 = vmov 9   ;;  %s772_s6 = smov 2   ;;  %s774_s7 = smov 126  }
   0x2   :  { %v806_v3 = vld [vmem:[%s1034_s1] sm:$0xff]  ;;  %60 = vmatprep.subr.mxu0 %v12_v0  ;;  %736 = vset.pattern.permute.xlu1 %v766_v5  ;;  %v815_v6 = vld [vmem:[%s1034_s1 + $0x8] sm:$0xff]  ;;  %vm596_vm14 = vcmask 130048  }
   0x3   :  { %17 = vperm.xlu0 %735, %v806_v3   ;;  %61 = vmatpush1.msra.mxu0 %v11_v1 }
   0x4   :  { %686 = vmatmul.mubr.msk.f32.vlgmr.msra.gmra.mxu0 %vm25_vm0, %v806_v3  ;;  %112 = vperm.xlu1 %736, %v806_v3  }
   0x5   :  { %100 = vmatprep.mubr.f32.mxu0 %v764_v2  ;;  %665 = vmatprep.mubr.f32.mxu1 %v764_v2 }
   0x7   :  { %22 = vperm.xlu0 %735, %v815_v6  }
   0x8   :  { %687 = vmatmul.mubr.msk.f32.gmra.mxu0 %vm25_vm0, %v815_v6  ;;  %116 = vperm.xlu1 %736, %v815_v6  }
   0xb   :  { %738 = vset.pattern.permute.xlu0 %v768_v50 }
   0xc   :  { %737 = vset.pattern.permute.xlu1 %v767_v49 }
  0x7e   :  { %v18_v7 = vpop.permute.xlu0 %17 }
  0x7f   :  { %v821_v8 = vpop.permute.xlu1 %112 }
  0x82   :  { %v23_v13 = vpop.permute.xlu0 %22 }
  0x83   :  { %v824_v17 = vpop.permute.xlu1 %116 }
  0xc4   :  { %v96_v9 = vpop.f32.mrf.mxu0 }
  0xc5   :  { %v97_v10 = vadd.f32 %v96_v9, %v18_v7 }
  0xc6   :  { %v98_v11 = vpop.f32.mrf.mxu0 }
  0xc7   :  { %v119_v12 = vmul.f32 %v821_v8, %v97_v10  ;;  %vm107_vm1 = vcmp.ge.f32.partialorder %v97_v10, 0.0  ;;  %v99_v15 = vadd.f32 %v98_v11, %v18_v7 }
  0xc8   :  { %v102_v14 = vpop.f32.mrf.mxu0 }
  0xc9   :  { %v103_v16 = vadd.f32 %v102_v14, %v23_v13  ;;  %v826_v19 = vsel %vm107_vm1, %v97_v10, %v119_v12  ;;  %v120_v22 = vmul.f32 %v821_v8, %v99_v15  ;;  %vm108_vm4 = vcmp.ge.f32.partialorder %v99_v15, 0.0 }
  0xca   :  { %v104_v18 = vpop.f32.mrf.mxu0  ;;  %v251_v26 = vmul.f32 %v826_v19, %v826_v19  ;;  %v771_v14 = vmov 10  }
  0xcb   :  { %vm109_vm2 = vcmp.ge.f32.partialorder %v103_v16, 0.0  ;;  %v121_v20 = vmul.f32 %v824_v17, %v103_v16  ;;  %v105_v21 = vadd.f32 %v104_v18, %v23_v13  ;;  %v841_v30 = vsel %vm108_vm4, %v99_v15, %v120_v22 }
  0xcc   :  { %v322_v33 = vmul.f32 %v841_v30, %v841_v30  ;;  %v773_v15 = vmov 12   ;;  %v775_v18 = vmov 13  }
  0xcd   :  { %v830_v23 = vsel %vm109_vm2, %v103_v16, %v121_v20  ;;  %vm110_vm3 = vcmp.ge.f32.partialorder %v105_v21, 0.0  ;;  %v122_v24 = vmul.f32 %v824_v17, %v105_v21  ;;  %v127_v20 = vlaneseq }
  0xce   :  { %v238_v25 = vadd.f32 %v830_v23, %v826_v19  ;;  %v252_v27 = vmul.f32 %v830_v23, %v830_v23 }
  0xcf   :  { %v839_v28 = vsel %vm110_vm3, %v105_v21, %v122_v24  ;;  %v878_v22 = vand.u32 127, %v127_v20 }
  0xd0   :  { %239 = vadd.xlane.f32.xlu0 %v238_v25  ;;  %v253_v29 = vadd.f32 %v252_v27, %v251_v26  ;;  %v309_v31 = vadd.f32 %v839_v28, %v841_v30  ;;  %v323_v32 = vmul.f32 %v839_v28, %v839_v28 }
  0xd1   :  { %vm199_vm7 = vcmp.lt.s32.totalorder %v878_v22, 126  ;;  %vm140_vm8 = vcmp.lt.s32.totalorder %v878_v22, 2  ;;  %vm145_vm9 = vcmp.ge.s32.totalorder %v878_v22, 2 }
  0xd2   :  { %254 = vadd.xlane.f32.xlu1 %v253_v29  ;;  %v324_v34 = vadd.f32 %v323_v32, %v322_v33 }
  0xd4   :  { %310 = vadd.xlane.f32.xlu0 %v309_v31  ;;  %v129_v31 = vadd.s32 128, %v878_v22 }
  0xd8   :  { %325 = vadd.xlane.f32.xlu0 %v324_v34  ;;  %v131_v34 = vand.u32 127, %v129_v31 }
  0xda   :  { %vm888_vm5 = vcmp.ge.s32.totalorder %v131_v34, 2  ;;  %vm898_vm6 = vcmp.lt.s32.totalorder %v131_v34, 126 }
 0x159   :  { %v240_v35 = vpop.xlane.xlu0 %239 }
 0x15a   :  { %v241_v36 = vrot.slane %v240_v35, 4 }
 0x15b   :  { %v255_v37 = vpop.xlane.xlu1 %254 }
 0x15c   :  { %v242_v38 = vadd.f32 %v241_v36, %v240_v35  ;;  %v256_v39 = vrot.slane %v255_v37, 4  ;;  %v776_v35 = vmov 14  }
 0x15d   :  { %v311_v51 = vpop.xlane.xlu0 %310 }
 0x15e   :  { %v243_v40 = vrot.slane %v242_v38, 2  ;;  %v257_v41 = vadd.f32 %v256_v39, %v255_v37  ;;  %v312_v53 = vrot.slane %v311_v51, 4 }
 0x160   :  { %v258_v42 = vrot.slane %v257_v41, 2  ;;  %v244_v43 = vadd.f32 %v243_v40, %v242_v38  ;;  %v313_v55 = vadd.f32 %v312_v53, %v311_v51  ;;  %v689_v38 = vsel %vm888_vm5, 1.0, %v764_v2 }
 0x161   :  { %v326_v52 = vpop.xlane.xlu0 %325 }
 0x162   :  { %v245_v44 = vrot.slane %v244_v43, 1  ;;  %v259_v45 = vadd.f32 %v258_v42, %v257_v41  ;;  %v327_v54 = vrot.slane %v326_v52, 4  ;;  %v314_v58 = vrot.slane %v313_v55, 2 }
 0x164   :  { %v246_v46 = vadd.f32 %v245_v44, %v244_v43  ;;  %v260_v47 = vrot.slane %v259_v45, 1  ;;  %v328_v56 = vadd.f32 %v327_v54, %v326_v52  ;;  %v315_v60 = vadd.f32 %v314_v58, %v313_v55 }
 0x165   :  { %v690_v43 = vsel %vm199_vm7, 1.0, %v764_v2 }
 0x166   :  { %694 = vpush %v246_v46  ;;  %v261_v48 = vadd.f32 %v260_v47, %v259_v45  ;;  %v329_v59 = vrot.slane %v328_v56, 2  ;;  %v316_v62 = vrot.slane %v315_v60, 1  ;;  %v691_v45 = vsel %vm898_vm6, 1.0, %v764_v2 }
 0x168   :  { %696 = vpush %v261_v48  ;;  %v330_v61 = vadd.f32 %v329_v59, %v328_v56  ;;  %v317_v1 = vadd.f32 %v316_v62, %v315_v60 }
 0x16a   :  { %v331_v63 = vrot.slane %v330_v61, 1 }
 0x16c   :  { %v332_v4 = vadd.f32 %v331_v63, %v330_v61 }
 0x197   :  { %s695_s1 = spop %694 }
 0x198   :  { %s849_s16 = smul.f32 0.00048828125, %s695_s1 }
 0x199   :  { %s697_s17 = spop %696 }
 0x19a   :  { %s266_s18 = smul.f32 %s849_s16, %s849_s16  ;;  %v276_v10 = vstv %s849_s16 }
 0x19b   :  { %s265_s19 = smul.f32 0.00048828125, %s697_s17 }
 0x19d   :  { %s267_s20 = ssub.f32 %s265_s19, %s266_s18 }
 0x19f   :  { %s268_s22 = smax.f32 %s769_s21, %s267_s20 }
 0x1a0   :  { %s269_s23 = sadd.f32 1e-08, %s268_s22 }
 0x1a2   :  { %v270_v57 = vstv %s269_s23 }
 0x1a3   :  { %756 = vrsqrt.f32 %v270_v57 }
 0x1b0   :  { %v757_v0 = vpop.eup %756 }
 0x1b1   :  { %698 = vpush %v757_v0 }
 0x1b2   :  { %700 = vpush %v317_v1 }
 0x1b3   :  { %702 = vpush %v332_v4 }
 0x1e2   :  { %s699_s24 = spop %698 }
 0x1e3   :  { %v273_v5 = vstv %s699_s24  ;;  %s701_s25 = spop %700 }
 0x1e4   :  { %v274_v7 = vmul.f32 %v273_v5, %v806_v3  ;;  %v275_v9 = vmul.f32 %v273_v5, %v815_v6  ;;  %s856_s26 = smul.f32 0.00048828125, %s701_s25  ;;  %s703_s27 = spop %702 }
 0x1e5   :  { %s336_s28 = smul.f32 0.00048828125, %s703_s27 }
 0x1e6   :  { %v277_v11 = vmul.f32 %v276_v10, %v274_v7  ;;  %v278_v12 = vmul.f32 %v276_v10, %v275_v9  ;;  %s337_s29 = smul.f32 %s856_s26, %s856_s26  ;;  %v347_v32 = vstv %s856_s26 }
 0x1e8   :  { %s338_s30 = ssub.f32 %s336_s28, %s337_s29  ;;  %283 = vrot.lane.b32.xlu0 %v278_v12, %s770_s3  ;;  %281 = vrot.lane.b32.xlu1 %v277_v11, %s770_s3 }
 0x1ea   :  { %s339_s4 = smax.f32 %s769_s21, %s338_s30 }
 0x1eb   :  { %s340_s5 = sadd.f32 1e-08, %s339_s4 }
 0x1ec   :  { %172 = vperm.xlu0 %738, %v806_v3   ;;  %152 = vperm.xlu1 %737, %v806_v3  }
 0x1ed   :  { %v341_v13 = vstv %s340_s5 }
 0x1ee   :  { %758 = vrsqrt.f32 %v341_v13 }
 0x1f0   :  { %741 = vset.pattern.permute.xlu0 %v771_v14  ;;  %156 = vperm.xlu1 %737, %v815_v6  }
 0x1f1   :  { %215 = vperm.xlu0 %741, %v815_v6  }
 0x1f4   :  { %739 = vset.pattern.permute.xlu1 %v768_v50 }
 0x1f5   :  { %136 = vrot.lane.b32.xlu0 %v841_v30, %s772_s6  ;;  %176 = vperm.xlu1 %739, %v815_v6  }
 0x1f6   :  { %742 = vset.pattern.permute.xlu0 %v773_v15 }
 0x1f9   :  { %191 = vrot.lane.b32.xlu0 %v826_v19, %s774_s7  ;;  %740 = vset.pattern.permute.xlu1 %v771_v14 }
 0x1fa   :  { %211 = vperm.xlu1 %740, %v806_v3  }
 0x1fb   :  { %v759_v16 = vpop.eup %758 }
 0x1fc   :  { %704 = vpush %v759_v16 }
 0x1fd   :  { %195 = vrot.lane.b32.xlu0 %v841_v30, %s774_s7 }
 0x1fe   :  { %132 = vrot.lane.b32.xlu1 %v826_v19, %s772_s6 }
 0x1ff   :  { %743 = vset.pattern.permute.xlu1 %v773_v15 }
 0x201   :  { %291 = vperm.xlu0 %742, %v274_v7  }
 0x202   :  { %134 = vrot.lane.b32.xlu1 %v830_v23, %s772_s6 }
 0x205   :  { %745 = vset.pattern.permute.xlu0 %v775_v18 }
 0x206   :  { %138 = vrot.lane.b32.xlu1 %v839_v28, %s772_s6 }
 0x20a   :  { %193 = vrot.lane.b32.xlu1 %v830_v23, %s774_s7 }
 0x20e   :  { %197 = vrot.lane.b32.xlu1 %v839_v28, %s774_s7 }
 0x212   :  { %296 = vperm.xlu1 %743, %v275_v9  }
 0x216   :  { %744 = vset.pattern.permute.xlu1 %v775_v18 }
 0x22d   :  { %s705_s8 = spop %704 }
 0x22e   :  { %v344_v21 = vstv %s705_s8 }
 0x22f   :  { %v345_v26 = vmul.f32 %v344_v21, %v806_v3  ;;  %v346_v36 = vmul.f32 %v344_v21, %v815_v6 }
 0x231   :  { %v348_v33 = vmul.f32 %v347_v32, %v345_v26  ;;  %v349_v41 = vmul.f32 %v347_v32, %v346_v36 }
 0x25a   :  { %v282_v24 = vpop.permute.xlu1 %281  ;;  %v284_v25 = vpop.permute.xlu0 %283 }
 0x25b   :  { %v287_v27 = vsub.f32 %v806_v3, %v282_v24  ;;  %v288_v29 = vsub.f32 %v815_v6, %v284_v25 }
 0x25d   :  { %301 = vperm.xlu1 %744, %v287_v27   ;;  %306 = vperm.xlu0 %745, %v288_v29   ;;  %v688_v27 = vsel %vm145_vm9, 1.0, %v764_v2 }
 0x261   :  { %746 = vset.pattern.permute.xlu1 %v776_v35  ;;  %352 = vrot.lane.b32.xlu0 %v348_v33, %s770_s3 }
 0x262   :  { %395 = vperm.xlu1 %746, %v806_v3   ;;  %747 = vset.pattern.permute.xlu0 %v773_v15 }
 0x265   :  { %364 = vperm.xlu0 %747, %v345_v26  }
 0x266   :  { %399 = vperm.xlu1 %746, %v815_v6  }
 0x267   :  { %v896_v39 = vpop.permute.xlu0 %172  ;;  %v153_v40 = vpop.permute.xlu1 %152 }
 0x268   :  { %v168_v42 = vmul.f32 %v689_v38, %v153_v40  ;;  %v180_v1 = vmul.f32 %v896_v39, %v841_v30  ;;  %v179_v32 = vmul.f32 %v896_v39, %v826_v19 }
 0x269   :  { %749 = vset.pattern.permute.xlu0 %v775_v18 }
 0x26a   :  { %354 = vrot.lane.b32.xlu1 %v349_v41, %s770_s3  ;;  %v188_v44 = vadd.f32 %v896_v39, %v168_v42 }
 0x26b   :  { %v157_v46 = vpop.permute.xlu1 %156  ;;  %748 = vset.pattern.permute.xlu1 %v773_v15 }
 0x26c   :  { %v907_v47 = vpop.permute.xlu0 %215  ;;  %v170_v48 = vmul.f32 %v689_v38, %v157_v46 }
 0x26d   :  { %v229_v49 = vmul.f32 %v691_v45, %v907_v47 }
 0x26e   :  { %369 = vperm.xlu1 %748, %v346_v36   ;;  %v167_v36 = vmul.f32 %v688_v27, %v153_v40 }
 0x270   :  { %v910_v50 = vpop.permute.xlu1 %176  ;;  %v137_v51 = vpop.permute.xlu0 %136 }
 0x271   :  { %v190_v52 = vadd.f32 %v910_v50, %v170_v48  ;;  %v182_v13 = vmul.f32 %v910_v50, %v839_v28  ;;  %v169_v48 = vmul.f32 %v688_v27, %v157_v46 }
 0x273   :  { %v913_v53 = vadd.f32 %v229_v49, %v190_v52  ;;  %v181_v49 = vmul.f32 %v910_v50, %v830_v23 }
 0x274   :  { %v192_v54 = vpop.permute.xlu0 %191 }
 0x275   :  { %v212_v55 = vpop.permute.xlu1 %211 }
 0x276   :  { %v227_v56 = vmul.f32 %v691_v45, %v212_v55  ;;  %v187_v45 = vadd.f32 %v896_v39, %v167_v36  ;;  %v226_v52 = vmul.f32 %v690_v43, %v212_v55 }
 0x278   :  { %v196_v57 = vpop.permute.xlu0 %195  ;;  %v917_v58 = vadd.f32 %v227_v56, %v188_v44 }
 0x279   :  { %v202_v59 = vsel %vm199_vm7, %v196_v57, %v192_v54  ;;  %v133_v60 = vpop.permute.xlu1 %132  ;;  %v200_v28 = vsel %vm199_vm7, %v192_v54, %v196_v57 }
 0x27a   :  { %v207_v61 = vsel %vm898_vm6, %v202_v59, 0.0  ;;  %v141_v62 = vsel %vm140_vm8, %v133_v60, %v137_v51  ;;  %v143_v25 = vsel %vm140_vm8, %v137_v51, %v133_v60  ;;  %v206_v34 = vsel %vm199_vm7, %v200_v28, 0.0 }
 0x27b   :  { %v219_v63 = vmul.f32 %v212_v55, %v207_v61  ;;  %v148_v0 = vsel %vm888_vm5, %v141_v62, 0.0  ;;  %v147_v26 = vsel %vm145_vm9, %v143_v25, 0.0  ;;  %v218_v44 = vmul.f32 %v212_v55, %v206_v34 }
 0x27c   :  { %v160_v4 = vmul.f32 %v153_v40, %v148_v0  ;;  %v159_v29 = vmul.f32 %v153_v40, %v147_v26  ;;  %v292_v38 = vpop.permute.xlu0 %291  ;;  %v228_v59 = vmul.f32 %v690_v43, %v907_v47  ;;  %v234_v61 = vadd.f32 %v226_v52, %v187_v45 }
 0x27d   :  { %v135_v5 = vpop.permute.xlu1 %134  ;;  %v189_v62 = vadd.f32 %v910_v50, %v169_v48 }
 0x27e   :  { %v184_v7 = vadd.f32 %v180_v1, %v160_v4  ;;  %v183_v37 = vadd.f32 %v179_v32, %v159_v29 }
 0x27f   :  { %v236_v4 = vadd.f32 %v228_v59, %v189_v62 }
 0x280   :  { %v231_v9 = vadd.f32 %v219_v63, %v184_v7  ;;  %v230_v51 = vadd.f32 %v218_v44, %v183_v37 }
 0x281   :  { %v139_v10 = vpop.permute.xlu1 %138 }
 0x282   :  { %v142_v11 = vsel %vm140_vm8, %v135_v5, %v139_v10  ;;  %v144_v31 = vsel %vm140_vm8, %v139_v10, %v135_v5  ;;  %v390_v60 = vmul.f32 %v292_v38, %v230_v51 }
 0x283   :  { %v150_v12 = vsel %vm888_vm5, %v142_v11, 0.0  ;;  %v149_v35 = vsel %vm145_vm9, %v144_v31, 0.0 }
 0x284   :  { %v162_v14 = vmul.f32 %v157_v46, %v150_v12  ;;  %v161_v19 = vmul.f32 %v157_v46, %v149_v35 }
 0x285   :  { %v194_v15 = vpop.permute.xlu1 %193 }
 0x286   :  { %v186_v16 = vadd.f32 %v182_v13, %v162_v14  ;;  %v185_v57 = vadd.f32 %v181_v49, %v161_v19 }
 0x289   :  { %v198_v18 = vpop.permute.xlu1 %197 }
 0x28a   :  { %v203_v30 = vsel %vm199_vm7, %v198_v18, %v194_v15  ;;  %v201_v33 = vsel %vm199_vm7, %v194_v15, %v198_v18 }
 0x28b   :  { %v209_v20 = vsel %vm898_vm6, %v203_v30, 0.0  ;;  %v208_v42 = vsel %vm199_vm7, %v201_v33, 0.0 }
 0x28c   :  { %v221_v21 = vmul.f32 %v907_v47, %v209_v20  ;;  %v220_v40 = vmul.f32 %v907_v47, %v208_v42 }
 0x28d   :  { %v297_v41 = vpop.permute.xlu1 %296 }
 0x28e   :  { %v233_v24 = vadd.f32 %v221_v21, %v186_v16  ;;  %v232_v22 = vadd.f32 %v220_v40, %v185_v57 }
 0x290   :  { %v392_v1 = vmul.f32 %v297_v41, %v232_v22 }
 0x2d8   :  { %v302_v54 = vpop.permute.xlu1 %301  ;;  %v307_v56 = vpop.permute.xlu0 %306 }
 0x2d9   :  { %v406_v0 = vmul.f32 %v302_v54, %v234_v61  ;;  %v408_v11 = vmul.f32 %v307_v56, %v236_v4 }
 0x2dc   :  { %v353_v63 = vpop.permute.xlu0 %352 }
 0x2dd   :  { %v358_v39 = vsub.f32 %v806_v3, %v353_v63  ;;  %v396_v46 = vpop.permute.xlu1 %395 }
 0x2de   :  { %v402_v23 = vadd.f32 %v396_v46, %v390_v60 }
 0x2df   :  { %378 = vperm.xlu0 %749, %v358_v39  }
 0x2e0   :  { %v410_v55 = vadd.f32 %v406_v0, %v402_v23  ;;  %v365_v5 = vpop.permute.xlu0 %364 }
 0x2e1   :  { %v391_v7 = vmul.f32 %v365_v5, %v231_v9  ;;  %v400_v10 = vpop.permute.xlu1 %399 }
 0x2e2   :  { %v404_v47 = vadd.f32 %v400_v10, %v392_v1  ;;  %v418_v14 = vmul.f32 %v410_v55, %v821_v8  ;;  %vm414_vm10 = vcmp.ge.f32.partialorder %v410_v55, 0.0 }
 0x2e3   :  { %v403_v12 = vadd.f32 %v396_v46, %v391_v7 }
 0x2e4   :  { %v412_v13 = vadd.f32 %v408_v11, %v404_v47  ;;  %v969_v18 = vsel %vm414_vm10, %v410_v55, %v418_v14  ;;  %v777_v11 = vmov 15  }
 0x2e5   :  { %v355_v50 = vpop.permute.xlu1 %354  ;;  %v439_v28 = vmul.f32 %v969_v18, %v969_v18  ;;  %751 = vset.pattern.permute.xlu1 %v777_v11 }
 0x2e6   :  { %v359_v15 = vsub.f32 %v815_v6, %v355_v50  ;;  %vm416_vm11 = vcmp.ge.f32.partialorder %v412_v13, 0.0  ;;  %v420_v16 = vmul.f32 %v412_v13, %v824_v17 }
 0x2e8   :  { %383 = vperm.xlu0 %749, %v359_v15   ;;  %v971_v30 = vsel %vm416_vm11, %v412_v13, %v420_v16 }
 0x2e9   :  { %v370_v9 = vpop.permute.xlu1 %369  ;;  %v426_v20 = vadd.f32 %v971_v30, %v969_v18  ;;  %v440_v26 = vmul.f32 %v971_v30, %v971_v30 }
 0x2ea   :  { %v393_v21 = vmul.f32 %v370_v9, %v233_v24 }
 0x2eb   :  { %427 = vadd.xlane.f32.xlu1 %v426_v20  ;;  %v441_v27 = vadd.f32 %v440_v26, %v439_v28 }
 0x2ec   :  { %v405_v25 = vadd.f32 %v400_v10, %v393_v21  ;;  %750 = vset.pattern.permute.xlu0 %v777_v11 }
 0x307   :  { %442 = vadd.xlane.f32.xlu0 %v441_v27 }
 0x35a   :  { %v379_v29 = vpop.permute.xlu0 %378 }
 0x35b   :  { %v407_v31 = vmul.f32 %v379_v29, %v917_v58  ;;  %v778_v29 = vmov 16  }
 0x35d   :  { %v411_v32 = vadd.f32 %v407_v31, %v403_v12 }
 0x35f   :  { %v419_v35 = vmul.f32 %v411_v32, %v821_v8  ;;  %vm415_vm12 = vcmp.ge.f32.partialorder %v411_v32, 0.0 }
 0x361   :  { %v983_v37 = vsel %vm415_vm12, %v411_v32, %v419_v35 }
 0x363   :  { %v384_v33 = vpop.permute.xlu0 %383 }
 0x364   :  { %v409_v34 = vmul.f32 %v384_v33, %v913_v53  ;;  %v510_v53 = vmul.f32 %v983_v37, %v983_v37 }
 0x366   :  { %v413_v24 = vadd.f32 %v409_v34, %v405_v25 }
 0x368   :  { %v421_v36 = vmul.f32 %v413_v24, %v824_v17  ;;  %vm417_vm13 = vcmp.ge.f32.partialorder %v413_v24, 0.0 }
 0x36a   :  { %v985_v38 = vsel %vm417_vm13, %v413_v24, %v421_v36 }
 0x36b   :  { %v497_v41 = vadd.f32 %v985_v38, %v983_v37  ;;  %v511_v58 = vmul.f32 %v985_v38, %v985_v38 }
 0x36d   :  { %498 = vadd.xlane.f32.xlu1 %v497_v41  ;;  %v512_v8 = vadd.f32 %v511_v58, %v510_v53  ;;  %v780_v58 = vmov 34  }
 0x371   :  { %513 = vadd.xlane.f32.xlu1 %v512_v8 }
 0x374   :  { %v428_v42 = vpop.xlane.xlu1 %427 }
 0x375   :  { %v429_v43 = vrot.slane %v428_v42, 4 }
 0x377   :  { %v430_v17 = vadd.f32 %v429_v43, %v428_v42 }
 0x379   :  { %v431_v44 = vrot.slane %v430_v17, 2 }
 0x37b   :  { %v432_v19 = vadd.f32 %v431_v44, %v430_v17 }
 0x37d   :  { %v433_v45 = vrot.slane %v432_v19, 1 }
 0x37f   :  { %v434_v48 = vadd.f32 %v433_v45, %v432_v19 }
 0x381   :  { %706 = vpush %v434_v48 }
 0x390   :  { %v443_v49 = vpop.xlane.xlu0 %442 }
 0x391   :  { %v444_v51 = vrot.slane %v443_v49, 4 }
 0x393   :  { %v445_v40 = vadd.f32 %v444_v51, %v443_v49 }
 0x395   :  { %v446_v52 = vrot.slane %v445_v40, 2 }
 0x397   :  { %v447_v54 = vadd.f32 %v446_v52, %v445_v40 }
 0x399   :  { %v448_v56 = vrot.slane %v447_v54, 1 }
 0x39b   :  { %v449_v57 = vadd.f32 %v448_v56, %v447_v54 }
 0x39d   :  { %708 = vpush %v449_v57 }
 0x3b2   :  { %s707_s9 = spop %706 }
 0x3b3   :  { %s993_s10 = smul.f32 0.00048828125, %s707_s9 }
 0x3b5   :  { %s454_s11 = smul.f32 %s993_s10, %s993_s10  ;;  %v464_v14 = vstv %s993_s10 }
 0x3ce   :  { %s709_s12 = spop %708 }
 0x3cf   :  { %s453_s13 = smul.f32 0.00048828125, %s709_s12 }
 0x3d1   :  { %s455_s14 = ssub.f32 %s453_s13, %s454_s11 }
 0x3d3   :  { %s456_s0 = smax.f32 %s769_s21, %s455_s14 }
 0x3d4   :  { %s457_s15 = sadd.f32 1e-08, %s456_s0 }
 0x3d6   :  { %v458_v59 = vstv %s457_s15 }
 0x3d7   :  { %760 = vrsqrt.f32 %v458_v59 }
 0x3e4   :  { %v761_v60 = vpop.eup %760 }
 0x3e5   :  { %710 = vpush %v761_v60 }
 0x3f6   :  { %v499_v22 = vpop.xlane.xlu1 %498 }
 0x3f7   :  { %v500_v61 = vrot.slane %v499_v22, 4 }
 0x3f9   :  { %v501_v62 = vadd.f32 %v500_v61, %v499_v22 }
 0x3fa   :  { %v514_v63 = vpop.xlane.xlu1 %513 }
 0x3fb   :  { %v502_v39 = vrot.slane %v501_v62, 2  ;;  %v515_v46 = vrot.slane %v514_v63, 4 }
 0x3fd   :  { %v516_v0 = vadd.f32 %v515_v46, %v514_v63  ;;  %v503_v23 = vadd.f32 %v502_v39, %v501_v62 }
 0x3ff   :  { %v517_v1 = vrot.slane %v516_v0, 2  ;;  %v504_v4 = vrot.slane %v503_v23, 1 }
 0x401   :  { %v505_v55 = vadd.f32 %v504_v4, %v503_v23  ;;  %v518_v5 = vadd.f32 %v517_v1, %v516_v0 }
 0x403   :  { %712 = vpush %v505_v55  ;;  %v519_v7 = vrot.slane %v518_v5, 1 }
 0x405   :  { %v520_v10 = vadd.f32 %v519_v7, %v518_v5 }
 0x407   :  { %714 = vpush %v520_v10 }
 0x416   :  { %s711_s1 = spop %710 }
 0x417   :  { %v461_v47 = vstv %s711_s1 }
 0x418   :  { %v462_v12 = vmul.f32 %v461_v47, %v806_v3  ;;  %v463_v13 = vmul.f32 %v461_v47, %v815_v6 }
 0x41a   :  { %v465_v50 = vmul.f32 %v464_v14, %v462_v12  ;;  %v466_v15 = vmul.f32 %v464_v14, %v463_v13 }
 0x41c   :  { %471 = vrot.lane.b32.xlu0 %v466_v15, %s770_s3 }
 0x434   :  { %s713_s16 = spop %712 }
 0x435   :  { %s509_s17 = smul.f32 0.00048828125, %s713_s16 }
 0x437   :  { %s525_s18 = smul.f32 %s509_s17, %s509_s17  ;;  %v535_v25 = vstv %s509_s17 }
 0x438   :  { %s715_s19 = spop %714 }
 0x439   :  { %s524_s20 = smul.f32 0.00048828125, %s715_s19 }
 0x43b   :  { %s526_s22 = ssub.f32 %s524_s20, %s525_s18 }
 0x43d   :  { %s527_s23 = smax.f32 %s769_s21, %s526_s22  ;;  %s779_s21 = smov 110  }
 0x43e   :  { %s528_s24 = sadd.f32 1e-08, %s527_s23 }
 0x440   :  { %v529_v16 = vstv %s528_s24 }
 0x441   :  { %762 = vrsqrt.f32 %v529_v16 }
 0x44e   :  { %v763_v9 = vpop.eup %762 }
 0x44f   :  { %716 = vpush %v763_v9 }
 0x480   :  { %s717_s25 = spop %716 }
 0x481   :  { %v532_v20 = vstv %s717_s25 }
 0x482   :  { %v534_v21 = vmul.f32 %v532_v20, %v815_v6  ;;  %v533_v26 = vmul.f32 %v532_v20, %v806_v3 }
 0x484   :  { %v537_v28 = vmul.f32 %v535_v25, %v534_v21  ;;  %555 = vperm.xlu0 %750, %v534_v21   ;;  %v536_v27 = vmul.f32 %v535_v25, %v533_v26 }
 0x486   :  { %542 = vrot.lane.b32.xlu1 %v537_v28, %s770_s3 }
 0x488   :  { %753 = vset.pattern.permute.xlu0 %v778_v29 }
 0x48a   :  { %540 = vrot.lane.b32.xlu1 %v536_v27, %s770_s3 }
 0x48e   :  { %469 = vrot.lane.b32.xlu1 %v465_v50, %s770_s3  ;;  %v472_v31 = vpop.permute.xlu0 %471 }
 0x48f   :  { %v476_v32 = vsub.f32 %v815_v6, %v472_v31 }
 0x492   :  { %484 = vperm.xlu1 %751, %v463_v13  }
 0x496   :  { %550 = vperm.xlu1 %751, %v533_v26  }
 0x49a   :  { %479 = vperm.xlu1 %751, %v462_v12  }
 0x49e   :  { %752 = vset.pattern.permute.xlu1 %v778_v29 }
 0x49f   :  { %494 = vperm.xlu1 %752, %v476_v32  }
 0x4f8   :  { %v543_v33 = vpop.permute.xlu1 %542 }
 0x4f9   :  { %v547_v34 = vsub.f32 %v815_v6, %v543_v33 }
 0x4fb   :  { %569 = vperm.xlu0 %753, %v547_v34  }
 0x4fc   :  { %v541_v35 = vpop.permute.xlu1 %540 }
 0x4fd   :  { %v546_v24 = vsub.f32 %v806_v3, %v541_v35 }
 0x4ff   :  { %564 = vperm.xlu0 %753, %v546_v24   ;;  %v556_v43 = vpop.permute.xlu0 %555 }
 0x500   :  { %v470_v36 = vpop.permute.xlu1 %469  ;;  %v579_v17 = vmul.f32 %v556_v43, %v985_v38 }
 0x501   :  { %v475_v41 = vsub.f32 %v806_v3, %v470_v36 }
 0x503   :  { %489 = vperm.xlu1 %752, %v475_v41   ;;  %592 = vrot.lane.b32.xlu0 %v806_v3, %s779_s21 }
 0x504   :  { %754 = vset.pattern.permute.xlu0 %v780_v58 }
 0x507   :  { %594 = vrot.lane.b32.xlu1 %v815_v6, %s779_s21  ;;  %585 = vperm.xlu0 %754, %v806_v3  }
 0x508   :  { %755 = vset.pattern.permute.xlu1 %v780_v58 }
 0x50b   :  { %589 = vperm.xlu1 %755, %v815_v6  }
 0x50d   :  { %v485_v53 = vpop.permute.xlu1 %484 }
 0x50e   :  { %v578_v19 = vmul.f32 %v485_v53, %v971_v30 }
 0x511   :  { %v551_v8 = vpop.permute.xlu1 %550 }
 0x512   :  { %v577_v51 = vmul.f32 %v551_v8, %v983_v37 }
 0x515   :  { %v480_v42 = vpop.permute.xlu1 %479 }
 0x516   :  { %v576_v6 = vmul.f32 %v480_v42, %v969_v18 }
 0x51a   :  { %v495_v44 = vpop.permute.xlu1 %494 }
 0x51b   :  { %v582_v49 = vadd.f32 %v578_v19, %v495_v44 }
 0x576   :  { %v570_v45 = vpop.permute.xlu0 %569 }
 0x577   :  { %v583_v48 = vadd.f32 %v579_v17, %v570_v45 }
 0x579   :  { %629 = vmatprep.subr.mxu1 %v583_v48 }
 0x57a   :  { %v565_v40 = vpop.permute.xlu0 %564  ;;  %630 = vmatpush1.msra.mxu1 %v582_v49 }
 0x57b   :  { %v581_v3 = vadd.f32 %v577_v51, %v565_v40 }
 0x57d   :  { %631 = vmatprep.subr.mxu1 %v581_v3 }
 0x57e   :  { %v490_v52 = vpop.permute.xlu1 %489  ;;  %v593_v56 = vpop.permute.xlu0 %592 }
 0x57f   :  { %v580_v54 = vadd.f32 %v576_v6, %v490_v52 }
 0x581   :  { %632 = vmatpush1.msra.mxu1 %v580_v54 }
 0x582   :  { %692 = vmatmul.mubr.msk.f32.vlgmr.msra.gmra.mxu1 %vm596_vm14, %v593_v56  ;;  %v595_v30 = vpop.permute.xlu1 %594  ;;  %v586_v38 = vpop.permute.xlu0 %585 }
 0x583   :  { %671 = vmatprep.mubr.f32.mxu1 %v764_v2 }
 0x586   :  { %693 = vmatmul.mubr.msk.f32.gmra.mxu1 %vm596_vm14, %v595_v30  ;;  %v590_v60 = vpop.permute.xlu1 %589 }
 0x642   :  { %v667_v57 = vpop.f32.mrf.mxu1 }
 0x643   :  { %v668_v37 = vadd.f32 %v667_v57, %v586_v38 }
 0x644   :  { %v669_v59 = vpop.f32.mrf.mxu1 }
 0x645   :  { %678 = vst [vmem:[%s1035_s2] sm:$0xff] %v668_v37  ;;  %v670_v18 = vadd.f32 %v669_v59, %v586_v38 }
 0x646   :  { %v673_v22 = vpop.f32.mrf.mxu1 }
 0x647   :  { %679 = vst [vmem:[%s1035_s2 + $0x8] sm:$0xff] %v670_v18  ;;  %v674_v61 = vadd.f32 %v673_v22, %v590_v60 }
 0x648   :  { %v675_v62 = vpop.f32.mrf.mxu1 }
 0x649   :  { %680 = vst [vmem:[%s1035_s2 + $0x10] sm:$0xff] %v674_v61  ;;  %v676_v2 = vadd.f32 %v675_v62, %v590_v60 }
 0x64b   :  { %681 = vst [vmem:[%s1035_s2 + $0x18] sm:$0xff] %v676_v2 }

</bundles_post_ra>
